<compile_context>
chip_gen: v6e
topology: v6e:2x2x1
jax: 0.10.0
libtpu: 0.0.40
codegen_flags: <defaults>
</compile_context>

<pallas_src>
import functools

import jax
import jax.numpy as jnp
from jax.experimental import pallas as pl
from jax.experimental.pallas import tpu as pltpu


def _round_up(x, m):
    return (x + m - 1) // m * m


# ----------------------------------------------------------------------------
# Fused kernel: one grid step = one batch block.
# Layout: channels on sublanes, (batch-folded) padded spatial on lanes.
# ----------------------------------------------------------------------------
def reed_fused_kernel(col1_ref, mask_ref, w1_ref, b1_ref, w2_ref, b2_ref,
                      out_ref, loss_ref, *, Wp, Cs, Ct):
    col1 = col1_ref[0]                       # (9*Cin, L)   L = lane-padded block
    mask = mask_ref[...]                     # (1, L)  1.0 on interior pixels
    L = col1.shape[-1]

    # ---- layer 1: student conv1 ∪ teacher conv1 as ONE matmul --------------
    # w1_ref: (Cs+Ct, 9*Cin).  Output is lane-dense (L lanes).
    feat = jnp.dot(w1_ref[...], col1, preferred_element_type=jnp.float32)
    feat = jnp.maximum(feat + b1_ref[...], 0.0) * mask        # (Cs+Ct, L)
    # mask zeroes the 1-px halo ring (and the lane-alignment tail), which is
    # exactly the SAME-conv zero padding layer 2 needs.

    # ---- layer 2 + dist adapter as ONE matmul (K=9*Cs, Cout=Cs+Ct) ---------
    # Tap (kh, kw) needs s_feat at lane offset delta = (kh-1)*Wp + (kw-1);
    # form it with an XLU lane roll (roll(x, -d)[r] == x[r + d]); wrap-around
    # only lands in halo / tail lanes, which are discarded.
    s_feat = feat[:Cs, :]                                      # (Cs, L)
    taps = []
    for kh in range(3):
        for kw in range(3):
            delta = (kh - 1) * Wp + (kw - 1)
            taps.append(s_feat if delta == 0
                        else pltpu.roll(s_feat, shift=(-delta) % L, axis=1))
    col2 = jnp.concatenate(taps, axis=0)                       # (9*Cs, L)
    out2 = jnp.dot(w2_ref[...], col2,
                   preferred_element_type=jnp.float32) + b2_ref[...]  # (Cs+Ct, L)

    # student conv2 output over the padded domain (halo sliced off host-side);
    # lane-dense, unmasked store.
    out_ref[0] = out2[:Cs, :].astype(out_ref.dtype)

    # dist module: squared error of 1x1-adapter(s_feat) vs teacher feature,
    # interior pixels only; one partial sum per block.
    d = (out2[Cs:, :] - feat[Cs:, :]) * mask
    loss_ref[0] = jnp.sum(d * d, keepdims=True)                # (1, 1)


# ----------------------------------------------------------------------------
# Host-side prep (tiny XLA ops fused into the jit).
# ----------------------------------------------------------------------------
def _prep_inputs(x_nchw, params, num_blocks):
    N, Cin, H, W = x_nchw.shape
    Cs = params["s_w1"].shape[-1]                 # 8
    Ct = params["t_w1"].shape[-1]                 # 16
    G = num_blocks
    NB = N // G                                   # batch elements per block
    Hp, Wp = H + 2, W + 2                         # 1-px-padded output domain
    Lb = _round_up(NB * Hp * Wp, 128)             # lane-aligned block length

    x = jnp.transpose(x_nchw, (0, 2, 3, 1)).astype(jnp.float32)       # NHWC
    xp = jnp.pad(x, ((0, 0), (2, 2), (2, 2), (0, 0)))                 # (N,H+4,W+4,Cin)
    # layer-1 im2col over the padded domain: taps*Cin on sublanes,
    # (batch, padded pixel) flattened onto lanes.
    cols = jnp.stack([xp[:, kh:kh + Hp, kw:kw + Wp, :]
                      for kh in range(3) for kw in range(3)], axis=1)  # (N,9,Hp,Wp,Cin)
    col1 = jnp.transpose(cols, (0, 1, 4, 2, 3)).reshape(N, 9 * Cin, Hp * Wp)
    col1 = (col1.reshape(G, NB, 9 * Cin, Hp * Wp)
                .transpose(0, 2, 1, 3)
                .reshape(G, 9 * Cin, NB * Hp * Wp))
    col1 = jnp.pad(col1, ((0, 0), (0, 0), (0, Lb - NB * Hp * Wp)))

    # interior mask over the padded domain (also kills the alignment tail)
    ii, jj = jnp.arange(Hp), jnp.arange(Wp)
    m = ((ii[:, None] >= 1) & (ii[:, None] <= H) &
         (jj[None, :] >= 1) & (jj[None, :] <= W)).astype(jnp.float32)
    mask = jnp.tile(m.reshape(1, Hp * Wp), (1, NB))
    mask = jnp.pad(mask, ((0, 0), (0, Lb - NB * Hp * Wp)))

    # matmul-ready weights (output channels on sublanes)
    w1 = jnp.concatenate([params["s_w1"], params["t_w1"]], axis=-1)    # (3,3,Cin,Cs+Ct)
    w1_T = w1.reshape(9 * Cin, Cs + Ct).T                              # (Cs+Ct, 9*Cin)
    b1_T = jnp.concatenate([params["s_b1"], params["t_b1"]]).reshape(-1, 1)

    # layer-2 weight flattened to (Cs, 9*Cs); dist 1x1 adapter folded in as Ct
    # extra output rows that only read the centre tap (tap index 4).
    w2 = jnp.transpose(params["s_w2"].reshape(9, Cs, Cs), (2, 0, 1)).reshape(Cs, 9 * Cs)
    dwb = jnp.zeros((Ct, 9 * Cs), jnp.float32).at[:, 4 * Cs:5 * Cs].set(params["d_w"].T)
    w2d_T = jnp.concatenate([w2, dwb], axis=0)                         # (Cs+Ct, 9*Cs)
    b2d_T = jnp.concatenate([params["s_b2"], params["d_b"]]).reshape(-1, 1)

    return col1, mask, w1_T, b1_T, w2d_T, b2d_T, (G, NB, Hp, Wp, Lb, Cs, Ct)


@functools.partial(jax.jit, static_argnames=("training", "num_blocks"))
def reed_forward(x_nchw, params, training=True, num_blocks=1):
    """Mirrors ReED.forward. Returns (out, loss) in training, out otherwise.

    num_blocks=1 folds the whole batch into one fat grid step (best on the
    single-TensorCore v5e/v6e); on v7x use num_blocks=2 so both cores get a
    block.
    """
    N, Cin, H, W = x_nchw.shape
    assert N % num_blocks == 0
    (col1, mask, w1_T, b1_T, w2d_T, b2d_T,
     (G, NB, Hp, Wp, Lb, Cs, Ct)) = _prep_inputs(x_nchw, params, num_blocks)

    kernel = functools.partial(reed_fused_kernel, Wp=Wp, Cs=Cs, Ct=Ct)
    # VMEM per step: double-buffered col1 block (2 * 36*Lb*4 B) + feat/col2/out
    # scratch, well under 1 MiB -- far below the *scoped* VMEM default
    # (~16 MiB v5e, ~32 MiB v6e/v7x), so no vmem_limit_bytes override needed.
    out_pad, sq = pl.pallas_call(
        kernel,
        out_shape=(jax.ShapeDtypeStruct((G, Cs, Lb), jnp.float32),
                   jax.ShapeDtypeStruct((G, 1, 1), jnp.float32)),
        grid_spec=pltpu.PrefetchScalarGridSpec(
            num_scalar_prefetch=0,
            grid=(G,),
            in_specs=[
                pl.BlockSpec((1, 9 * Cin, Lb), lambda g: (g, 0, 0)),   # col1
                pl.BlockSpec((1, Lb), lambda g: (0, 0)),               # mask
                pl.BlockSpec((Cs + Ct, 9 * Cin), lambda g: (0, 0)),    # w1
                pl.BlockSpec((Cs + Ct, 1), lambda g: (0, 0)),          # b1
                pl.BlockSpec((Cs + Ct, 9 * Cs), lambda g: (0, 0)),     # w2 (+d_w)
                pl.BlockSpec((Cs + Ct, 1), lambda g: (0, 0)),          # b2 (+d_b)
            ],
            out_specs=[
                pl.BlockSpec((1, Cs, Lb), lambda g: (g, 0, 0)),        # conv2 out
                pl.BlockSpec((1, 1, 1), lambda g: (g, 0, 0)),          # loss partial
            ],
        ),
        compiler_params=pltpu.CompilerParams(
            dimension_semantics=("parallel",)),
    )(col1, mask, w1_T, b1_T, w2d_T, b2d_T)

    # tiny host-side XLA: drop the lane-alignment tail and the 1-px halo, NCHW
    out = (out_pad[:, :, :NB * Hp * Wp]
           .reshape(G, Cs, NB, Hp, Wp)[:, :, :, 1:H + 1, 1:W + 1]
           .transpose(0, 2, 1, 3, 4)
           .reshape(N, Cs, H, W))
    if not training:
        # TODO(synk): eval mode could use a student-only kernel; the fused one
        # is reused here (teacher/dist work is wasted but harmless).
        return out
    # one dist module -> stack([mse]).mean() == mse
    loss = jnp.sum(sq) / (N * H * W * Ct)
    return out, loss


# ----------------------------------------------------------------------------
# Parameter init (deterministic) — same synthetic student/teacher/dist setup.
# ----------------------------------------------------------------------------
def init_params(key):
    ks = jax.random.split(key, 8)

    def conv_w(k, cin, cout):
        fan_in = 3 * 3 * cin
        return jax.random.normal(k, (3, 3, cin, cout), jnp.float32) / jnp.sqrt(fan_in)

    return {
        # student
        "s_w1": conv_w(ks[0], 4, 8),   "s_b1": jnp.zeros((8,), jnp.float32),
        "s_w2": conv_w(ks[1], 8, 8),   "s_b2": jnp.zeros((8,), jnp.float32),
        # teacher (frozen; its second conv is never needed by the hook)
        "t_w1": conv_w(ks[2], 4, 16),  "t_b1": jnp.zeros((16,), jnp.float32),
        "t_w2": conv_w(ks[3], 16, 8),  "t_b2": jnp.zeros((8,), jnp.float32),
        # dist module: 1x1 conv adapter 8 -> 16
        "d_w": jax.random.normal(ks[4], (8, 16), jnp.float32) / jnp.sqrt(8.0),
        "d_b": jnp.zeros((16,), jnp.float32),
    }


# ----------------------------------------------------------------------------
# Pure-JAX reference for a sanity check.
# ----------------------------------------------------------------------------
def _ref_conv3x3(x_nhwc, w, b, relu):
    y = jax.lax.conv_general_dilated(
        x_nhwc, w, window_strides=(1, 1), padding="SAME",
        dimension_numbers=("NHWC", "HWIO", "NHWC"))
    y = y + b.reshape(1, 1, 1, -1)
    return jnp.maximum(y, 0.0) if relu else y


def _ref_forward(x_nchw, params):
    x = jnp.transpose(x_nchw, (0, 2, 3, 1))
    s_feat = _ref_conv3x3(x, params["s_w1"], params["s_b1"], True)
    s_out = _ref_conv3x3(s_feat, params["s_w2"], params["s_b2"], False)
    t_feat = _ref_conv3x3(x, params["t_w1"], params["t_b1"], True)
    proj = jnp.einsum("nhwc,cd->nhwd", s_feat, params["d_w"]) + params["d_b"]
    loss = jnp.mean((proj - t_feat) ** 2)
    return jnp.transpose(s_out, (0, 3, 1, 2)), loss


if __name__ == "__main__":
    key = jax.random.PRNGKey(0)
    k_x, k_p = jax.random.split(key)
    x = jax.random.normal(k_x, (2, 4, 16, 16), jnp.float32)   # NCHW, like torch
    params = init_params(k_p)

    out, loss = reed_forward(x, params, training=True)
    out = jax.block_until_ready(out)
    loss = jax.block_until_ready(loss)

    ref_out, ref_loss = _ref_forward(x, params)
    assert jnp.allclose(out, ref_out, rtol=1e-4, atol=1e-4)
    assert jnp.allclose(loss, ref_loss, rtol=1e-4, atol=1e-4)

    print("KERNEL_OK")
</pallas_src>

<mosaic_0001>
module attributes {stable_mosaic.version = 11 : i64} {
  func.func @reed_fused_kernel(%arg0: i32, %arg1: memref<1x36x768xf32, #tpu.memory_space<vmem>>, %arg2: memref<1x768xf32, #tpu.memory_space<vmem>>, %arg3: memref<24x36xf32, #tpu.memory_space<vmem>>, %arg4: memref<24x1xf32, #tpu.memory_space<vmem>>, %arg5: memref<24x72xf32, #tpu.memory_space<vmem>>, %arg6: memref<24x1xf32, #tpu.memory_space<vmem>>, %arg7: memref<1x8x768xf32, #tpu.memory_space<vmem>>, %arg8: memref<1x1x1xf32, #tpu.memory_space<vmem>>) attributes {dimension_semantics = [#tpu.dimension_semantics<parallel>], iteration_bounds = array<i64: 1>, scalar_prefetch = 0 : i64, scratch_operands = 0 : i64, tpu.core_type = #tpu.core_type<tc>, window_params = [{transform_indices = @transform_0, window_bounds = array<i64: 1, 36, 768>}, {pipeline_mode = #tpu.pipeline_mode<synchronous>, transform_indices = @transform_1, window_bounds = array<i64: 1, 768>}, {pipeline_mode = #tpu.pipeline_mode<synchronous>, transform_indices = @transform_2, window_bounds = array<i64: 24, 36>}, {pipeline_mode = #tpu.pipeline_mode<synchronous>, transform_indices = @transform_3, window_bounds = array<i64: 24, 1>}, {pipeline_mode = #tpu.pipeline_mode<synchronous>, transform_indices = @transform_4, window_bounds = array<i64: 24, 72>}, {pipeline_mode = #tpu.pipeline_mode<synchronous>, transform_indices = @transform_5, window_bounds = array<i64: 24, 1>}, {transform_indices = @transform_6, window_bounds = array<i64: 1, 8, 768>}, {transform_indices = @transform_7, window_bounds = array<i64: 1, 1, 1>}]} {
    %c0 = arith.constant 0 : index
    %c0_0 = arith.constant 0 : index
    %c0_1 = arith.constant 0 : index
    %0 = vector.load %arg1[%c0, %c0_0, %c0_1] : memref<1x36x768xf32, #tpu.memory_space<vmem>>, vector<1x36x768xf32>
    %1 = vector.shape_cast %0 : vector<1x36x768xf32> to vector<36x768xf32>
    %c0_2 = arith.constant 0 : index
    %c0_3 = arith.constant 0 : index
    %2 = vector.load %arg2[%c0_2, %c0_3] : memref<1x768xf32, #tpu.memory_space<vmem>>, vector<1x768xf32>
    %c0_4 = arith.constant 0 : index
    %c0_5 = arith.constant 0 : index
    %3 = vector.load %arg3[%c0_4, %c0_5] : memref<24x36xf32, #tpu.memory_space<vmem>>, vector<24x36xf32>
    %cst = arith.constant dense<0.000000e+00> : vector<24x768xf32>
    %4 = tpu.matmul %3, %1, %cst {dimension_numbers = #tpu.dot_dimension_numbers<[1], [0], [0], [1], [0, 0, 1, 1], [], []>} : vector<24x36xf32>, vector<36x768xf32>, vector<24x768xf32> -> vector<24x768xf32>
    %c0_6 = arith.constant 0 : index
    %c0_7 = arith.constant 0 : index
    %5 = vector.load %arg4[%c0_6, %c0_7] : memref<24x1xf32, #tpu.memory_space<vmem>>, vector<24x1xf32>
    %6 = vector.broadcast %5 : vector<24x1xf32> to vector<24x768xf32>
    %7 = arith.addf %4, %6 : vector<24x768xf32>
    %cst_8 = arith.constant 0.000000e+00 : f32
    %8 = vector.broadcast %cst_8 : f32 to vector<24x768xf32>
    %9 = arith.maximumf %7, %8 : vector<24x768xf32>
    %10 = vector.broadcast %2 : vector<1x768xf32> to vector<24x768xf32>
    %11 = arith.mulf %9, %10 : vector<24x768xf32>
    %12 = vector.extract_strided_slice %11 {offsets = [0, 0], sizes = [8, 768], strides = [1, 1]} : vector<24x768xf32> to vector<8x768xf32>
    %c19_i32 = arith.constant 19 : i32
    %13 = tpu.dynamic_rotate %12 by %c19_i32 dim 1 : vector<8x768xf32>, i32 -> vector<8x768xf32>
    %c18_i32 = arith.constant 18 : i32
    %14 = tpu.dynamic_rotate %12 by %c18_i32 dim 1 : vector<8x768xf32>, i32 -> vector<8x768xf32>
    %c17_i32 = arith.constant 17 : i32
    %15 = tpu.dynamic_rotate %12 by %c17_i32 dim 1 : vector<8x768xf32>, i32 -> vector<8x768xf32>
    %c1_i32 = arith.constant 1 : i32
    %16 = tpu.dynamic_rotate %12 by %c1_i32 dim 1 : vector<8x768xf32>, i32 -> vector<8x768xf32>
    %c767_i32 = arith.constant 767 : i32
    %17 = tpu.dynamic_rotate %12 by %c767_i32 dim 1 : vector<8x768xf32>, i32 -> vector<8x768xf32>
    %c751_i32 = arith.constant 751 : i32
    %18 = tpu.dynamic_rotate %12 by %c751_i32 dim 1 : vector<8x768xf32>, i32 -> vector<8x768xf32>
    %c750_i32 = arith.constant 750 : i32
    %19 = tpu.dynamic_rotate %12 by %c750_i32 dim 1 : vector<8x768xf32>, i32 -> vector<8x768xf32>
    %c749_i32 = arith.constant 749 : i32
    %20 = tpu.dynamic_rotate %12 by %c749_i32 dim 1 : vector<8x768xf32>, i32 -> vector<8x768xf32>
    %21 = tpu.concatenate %13, %14, %15, %16, %12, %17, %18, %19, %20 in 0 : vector<8x768xf32>, vector<8x768xf32>, vector<8x768xf32>, vector<8x768xf32>, vector<8x768xf32>, vector<8x768xf32>, vector<8x768xf32>, vector<8x768xf32>, vector<8x768xf32> -> vector<72x768xf32>
    %c0_9 = arith.constant 0 : index
    %c0_10 = arith.constant 0 : index
    %22 = vector.load %arg5[%c0_9, %c0_10] : memref<24x72xf32, #tpu.memory_space<vmem>>, vector<24x72xf32>
    %cst_11 = arith.constant dense<0.000000e+00> : vector<24x768xf32>
    %23 = tpu.matmul %22, %21, %cst_11 {dimension_numbers = #tpu.dot_dimension_numbers<[1], [0], [0], [1], [0, 0, 1, 1], [], []>} : vector<24x72xf32>, vector<72x768xf32>, vector<24x768xf32> -> vector<24x768xf32>
    %c0_12 = arith.constant 0 : index
    %c0_13 = arith.constant 0 : index
    %24 = vector.load %arg6[%c0_12, %c0_13] : memref<24x1xf32, #tpu.memory_space<vmem>>, vector<24x1xf32>
    %25 = vector.broadcast %24 : vector<24x1xf32> to vector<24x768xf32>
    %26 = arith.addf %23, %25 : vector<24x768xf32>
    %27 = vector.extract_strided_slice %26 {offsets = [0, 0], sizes = [8, 768], strides = [1, 1]} : vector<24x768xf32> to vector<8x768xf32>
    %c0_14 = arith.constant 0 : index
    %c0_15 = arith.constant 0 : index
    %c0_16 = arith.constant 0 : index
    %28 = vector.load %arg7[%c0_14, %c0_15, %c0_16] : memref<1x8x768xf32, #tpu.memory_space<vmem>>, vector<1x8x768xf32>
    %29 = vector.shape_cast %28 : vector<1x8x768xf32> to vector<8x768xf32>
    %30 = vector.shape_cast %27 : vector<8x768xf32> to vector<1x8x768xf32>
    tpu.vector_store %arg7[%c0_14, %c0_15, %c0_16], %30 {strides = array<i32>} : memref<1x8x768xf32, #tpu.memory_space<vmem>>, vector<1x8x768xf32>,
    %31 = vector.extract_strided_slice %26 {offsets = [8, 0], sizes = [16, 768], strides = [1, 1]} : vector<24x768xf32> to vector<16x768xf32>
    %32 = vector.extract_strided_slice %11 {offsets = [8, 0], sizes = [16, 768], strides = [1, 1]} : vector<24x768xf32> to vector<16x768xf32>
    %33 = arith.subf %31, %32 : vector<16x768xf32>
    %34 = vector.broadcast %2 : vector<1x768xf32> to vector<16x768xf32>
    %35 = arith.mulf %33, %34 : vector<16x768xf32>
    %36 = arith.mulf %35, %35 : vector<16x768xf32>
    %37 = vector.shape_cast %36 : vector<16x768xf32> to vector<1x16x768xf32>
    %cst_17 = arith.constant dense<0.000000e+00> : vector<1xf32>
    %38 = vector.multi_reduction <add>, %37, %cst_17 [1, 2] : vector<1x16x768xf32> to vector<1xf32>
    %39 = vector.shape_cast %38 : vector<1xf32> to vector<1x1x1xf32>
    %40 = vector.extract %39[0, 0, 0] : f32 from vector<1x1x1xf32>
    %41 = vector.broadcast %40 : f32 to vector<1x1xf32>
    %c0_18 = arith.constant 0 : index
    %c0_19 = arith.constant 0 : index
    %c0_20 = arith.constant 0 : index
    %42 = vector.load %arg8[%c0_18, %c0_19, %c0_20] : memref<1x1x1xf32, #tpu.memory_space<vmem>>, vector<1x1x1xf32>
    %43 = vector.shape_cast %42 : vector<1x1x1xf32> to vector<1x1xf32>
    %44 = vector.shape_cast %41 : vector<1x1xf32> to vector<1x1x1xf32>
    tpu.vector_store %arg8[%c0_18, %c0_19, %c0_20], %44 {strides = array<i32>} : memref<1x1x1xf32, #tpu.memory_space<vmem>>, vector<1x1x1xf32>,
    return
  }
  func.func @transform_0(%arg0: i32) -> (i32, i32, i32) {
    %c0_i32 = arith.constant 0 : i32
    %c0_i32_0 = arith.constant 0 : i32
    %c0_i32_1 = arith.constant 0 : i32
    return %arg0, %c0_i32, %c0_i32_0 : i32, i32, i32
  }
  func.func @transform_1(%arg0: i32) -> (i32, i32) {
    %c0_i32 = arith.constant 0 : i32
    %c0_i32_0 = arith.constant 0 : i32
    %c0_i32_1 = arith.constant 0 : i32
    return %c0_i32, %c0_i32_0 : i32, i32
  }
  func.func @transform_2(%arg0: i32) -> (i32, i32) {
    %c0_i32 = arith.constant 0 : i32
    %c0_i32_0 = arith.constant 0 : i32
    %c0_i32_1 = arith.constant 0 : i32
    return %c0_i32, %c0_i32_0 : i32, i32
  }
  func.func @transform_3(%arg0: i32) -> (i32, i32) {
    %c0_i32 = arith.constant 0 : i32
    %c0_i32_0 = arith.constant 0 : i32
    %c0_i32_1 = arith.constant 0 : i32
    return %c0_i32, %c0_i32_0 : i32, i32
  }
  func.func @transform_4(%arg0: i32) -> (i32, i32) {
    %c0_i32 = arith.constant 0 : i32
    %c0_i32_0 = arith.constant 0 : i32
    %c0_i32_1 = arith.constant 0 : i32
    return %c0_i32, %c0_i32_0 : i32, i32
  }
  func.func @transform_5(%arg0: i32) -> (i32, i32) {
    %c0_i32 = arith.constant 0 : i32
    %c0_i32_0 = arith.constant 0 : i32
    %c0_i32_1 = arith.constant 0 : i32
    return %c0_i32, %c0_i32_0 : i32, i32
  }
  func.func @transform_6(%arg0: i32) -> (i32, i32, i32) {
    %c0_i32 = arith.constant 0 : i32
    %c0_i32_0 = arith.constant 0 : i32
    %c0_i32_1 = arith.constant 0 : i32
    return %arg0, %c0_i32, %c0_i32_0 : i32, i32, i32
  }
  func.func @transform_7(%arg0: i32) -> (i32, i32, i32) {
    %c0_i32 = arith.constant 0 : i32
    %c0_i32_0 = arith.constant 0 : i32
    %c0_i32_1 = arith.constant 0 : i32
    return %arg0, %c0_i32, %c0_i32_0 : i32, i32, i32
  }
}

</mosaic_0001>

<bundles_post_ra>
// kernel: reed_forward.1
= control target key start
LH: loop header
LB: loop body
LE: loop exit
PB: predicated region body
PF: predicated region fallthrough
CT: control target
= control target key end

     0   :  { %vm88_vm0 = vcmask 1043456   ;;  %vm78_vm1 = vcmask 293888   ;;  %v1001_v21 = vmov 0.0   ;;  %s1676_s0 = inlined_call_operand.vmem [shape: f32[1,36,768], index: 0, kind: input, shape index: {}]   ;;  %s1677_s1 = inlined_call_operand.vmem [shape: f32[1,768], index: 1, kind: input, shape index: {}]   ;;  %s1678_s2 = inlined_call_operand.vmem [shape: f32[24,36], index: 2, kind: input, shape index: {}]   ;;  %s1679_s3 = inlined_call_operand.vmem [shape: f32[24,1], index: 3, kind: input, shape index: {}]   ;;  %s1680_s4 = inlined_call_operand.vmem [shape: f32[24,72], index: 4, kind: input, shape index: {}]   ;;  %s1681_s5 = inlined_call_operand.vmem [shape: f32[24,1], index: 5, kind: input, shape index: {}]   ;;  %s1682_s6 = inlined_call_operand.vmem [shape: f32[1,8,768], index: 6, kind: output, shape index: {0}]   ;;  %s1683_s7 = inlined_call_operand.hbm [shape: f32[1,1,1], index: 7, kind: output, shape index: {1}]  }
   0x1   :  { %v51_v0 = vld [vmem:[%s1676_s0 + $0xc8] sm:$0xf]  ;;  %v53_v1 = vld [vmem:[%s1676_s0 + $0xd8] sm:$0xf]  ;;  %v50_v3 = vld [vmem:[%s1676_s0 + $0xc0] sm:$0xf]  ;;  %171 = vmatprep.mubr.f32.mxu0 %v1001_v21  ;;  %254 = vmatprep.mubr.f32.mxu1 %v1001_v21 }
   0x2   :  { %v45_v2 = vld [vmem:[%s1676_s0 + $0x98] sm:$0xff]  ;;  %940 = vmatprep.subr.msk.mxu0 %vm88_vm0, %v51_v0  ;;  %945 = vmatprep.subr.msk.mxu1 %vm88_vm0, %v53_v1  ;;  %v52_v4 = vld [vmem:[%s1676_s0 + $0xd0] sm:$0xf]  ;;  %v47_v5 = vld [vmem:[%s1676_s0 + $0xa8] sm:$0xff] }
   0x3   :  { %941 = vmatpush1.msk.msra.mxu0 %vm88_vm0, %v50_v3  ;;  %946 = vmatpush1.msk.msra.mxu1 %vm88_vm0, %v52_v4  ;;  %v44_v6 = vld [vmem:[%s1676_s0 + $0x90] sm:$0xff]  ;;  %v46_v7 = vld [vmem:[%s1676_s0 + $0xa0] sm:$0xff]  ;;  %v39_v8 = vld [vmem:[%s1676_s0 + $0x68] sm:$0xff] }
   0x4   :  { %131 = vmatprep.subr.mxu0 %v45_v2  ;;  %214 = vmatprep.subr.mxu1 %v47_v5  ;;  %v41_v9 = vld [vmem:[%s1676_s0 + $0x78] sm:$0xff]  ;;  %v38_v10 = vld [vmem:[%s1676_s0 + $0x60] sm:$0xff]  ;;  %v40_v11 = vld [vmem:[%s1676_s0 + $0x70] sm:$0xff] }
   0x5   :  { %132 = vmatpush1.msra.mxu0 %v44_v6  ;;  %215 = vmatpush1.msra.mxu1 %v46_v7  ;;  %v33_v12 = vld [vmem:[%s1676_s0 + $0x38] sm:$0xff]  ;;  %v35_v13 = vld [vmem:[%s1676_s0 + $0x48] sm:$0xff]  ;;  %v32_v14 = vld [vmem:[%s1676_s0 + $0x30] sm:$0xff] }
   0x6   :  { %133 = vmatprep.subr.mxu0 %v39_v8  ;;  %216 = vmatprep.subr.mxu1 %v41_v9  ;;  %v34_v15 = vld [vmem:[%s1676_s0 + $0x40] sm:$0xff]  ;;  %v27_v16 = vld [vmem:[%s1676_s0 + $0x8] sm:$0xff]  ;;  %v29_v17 = vld [vmem:[%s1676_s0 + $0x18] sm:$0xff] }
   0x7   :  { %134 = vmatpush1.msra.mxu0 %v38_v10  ;;  %217 = vmatpush1.msra.mxu1 %v40_v11  ;;  %v26_v18 = vld [vmem:[%s1676_s0] sm:$0xff]  ;;  %v28_v19 = vld [vmem:[%s1676_s0 + $0x10] sm:$0xff]  ;;  %v55_v22 = vld [vmem:[%s1676_s0 + $0xe8] sm:$0xf] }
   0x8   :  { %135 = vmatprep.subr.mxu0 %v33_v12  ;;  %218 = vmatprep.subr.mxu1 %v35_v13  ;;  %v57_v20 = vld [vmem:[%s1678_s2] sm:$0xff] }
   0x9   :  { %136 = vmatpush1.msra.mxu0 %v32_v14  ;;  %219 = vmatpush1.msra.mxu1 %v34_v15  ;;  %v54_v23 = vld [vmem:[%s1676_s0 + $0xe0] sm:$0xf] }
   0xa   :  { %137 = vmatprep.subr.mxu0 %v27_v16  ;;  %220 = vmatprep.subr.mxu1 %v29_v17 }
   0xb   :  { %138 = vmatpush1.msra.mxu0 %v26_v18  ;;  %221 = vmatpush1.msra.mxu1 %v28_v19 }
   0xc   :  { %13 = vsyncpa [#allocation3], 0  ;;  %942 = vmatmul.mubr.msk.f32.vlgmr.msra.gmra.mxu0 %vm78_vm1, %v57_v20  ;;  %947 = vmatmul.mubr.msk.f32.vlgmr.msra.gmra.mxu1 %vm78_vm1, %v57_v20  ;;  %v49_v24 = vld [vmem:[%s1676_s0 + $0xb8] sm:$0xff]  ;;  %v60_v25 = vld [vmem:[%s1679_s3] sm:$0xff]  ;;  %v1002_v28 = vmov 0   ;;  %v375_v36 = vlaneseq  ;;  %s1004_s23 = smov 110  }
   0xd   :  { %950 = vmatprep.subr.msk.mxu0 %vm88_vm0, %v55_v22  ;;  %177 = vmatprep.mubr.f32.mxu0 %v1001_v21  ;;  %v58_v26 = vld [vmem:[%s1678_s2 + $0x8] sm:$0xff]  ;;  %v48_v27 = vld [vmem:[%s1676_s0 + $0xb0] sm:$0xff]  ;;  %v42_v30 = vld [vmem:[%s1676_s0 + $0x80] sm:$0xff]  ;;  %s1005_s24 = smov 111   ;;  %s1006_s25 = smov 127   ;;  %vm598_vm10 = vcmask 588800  }
   0xe   :  { %951 = vmatpush1.msk.msra.mxu0 %vm88_vm0, %v54_v23  ;;  %977 = vset.pattern.permute.xlu0 %v1002_v28  ;;  %v43_v29 = vld [vmem:[%s1676_s0 + $0x88] sm:$0xff]  ;;  %v59_v31 = vld [vmem:[%s1678_s2 + $0x10] sm:$0xff]  ;;  %v37_v32 = vld [vmem:[%s1676_s0 + $0x58] sm:$0xff]  ;;  %v1181_v37 = vshrl.u32 %v375_v36, 7  ;;  %s1007_s26 = smov 17   ;;  %s1008_s27 = smov 19  }
   0xf   :  { %297 = vmatprep.subr.mxu0 %v49_v24  ;;  %65 = vperm.xlu0 %977, %v60_v25   ;;  %v36_v33 = vld [vmem:[%s1676_s0 + $0x50] sm:$0xff]  ;;  %v31_v34 = vld [vmem:[%s1676_s0 + $0x28] sm:$0xff]  ;;  %v30_v35 = vld [vmem:[%s1676_s0 + $0x20] sm:$0xff]  ;;  %s1009_s28 = smov 1   ;;  %s1010_s29 = smov 18   ;;  %vm920_vm11 = vcmask 0  }
  0x10   :  { %943 = vmatmul.mubr.msk.f32.gmra.mxu0 %vm78_vm1, %v58_v26  ;;  %978 = vset.pattern.permute.xlu1 %v1002_v28  ;;  %v397_v38 = vsub.s32 5, %v1181_v37  ;;  %v1187_v39 = vld [vmem:[%s1677_s1] sm:$0x3f]  ;;  %v377_v41 = vsub.s32 0, %v1181_v37  ;;  %v385_v42 = vsub.s32 2, %v1181_v37  ;;  %s1003_s1 = smov 109  }
  0x11   :  { %298 = vmatpush1.msra.mxu0 %v48_v27  ;;  %183 = vmatprep.mubr.f32.mxu0 %v1001_v21  ;;  %v381_v56 = vsub.s32 1, %v1181_v37  ;;  %v389_v63 = vsub.s32 3, %v1181_v37  ;;  %v393_v8 = vsub.s32 4, %v1181_v37  ;;  %v581_v16 = vld [vmem:[%s1681_s5 + $0x8] sm:$0xff]  ;;  %v582_v18 = vld [vmem:[%s1681_s5 + $0x10] sm:$0xff] }
  0x12   :  { %299 = vmatprep.subr.mxu0 %v43_v29  ;;  %260 = vmatprep.mubr.f32.mxu1 %v1001_v21  ;;  %v1190_v40 = vrot.slane %v1187_v39, %v397_v38  ;;  %v1198_v47 = vrot.slane %v1187_v39, %v377_v41  ;;  %v1202_v49 = vrot.slane %v1187_v39, %v385_v42  ;;  %v61_v17 = vld [vmem:[%s1679_s3 + $0x8] sm:$0xff]  ;;  %v62_v19 = vld [vmem:[%s1679_s3 + $0x10] sm:$0xff] }
  0x13   :  { %300 = vmatpush1.msra.mxu0 %v42_v30  ;;  %948 = vmatmul.mubr.msk.f32.gmra.mxu1 %vm78_vm1, %v58_v26  ;;  %v1233_v58 = vrot.slane %v1187_v39, %v381_v56  ;;  %v1265_v2 = vrot.slane %v1187_v39, %v389_v63  ;;  %v1293_v10 = vrot.slane %v1187_v39, %v393_v8 }
  0x14   :  { %944 = vmatmul.mubr.msk.f32.gmra.mxu0 %vm78_vm1, %v59_v31  ;;  %301 = vmatprep.subr.mxu0 %v37_v32  ;;  %v1374_v32 = vand.u32 127, %v375_v36 }
  0x15   :  { %302 = vmatpush1.msra.mxu0 %v36_v33  ;;  %337 = vmatprep.mubr.f32.mxu0 %v1001_v21 }
  0x16   :  { %303 = vmatprep.subr.mxu0 %v31_v34  ;;  %266 = vmatprep.mubr.f32.mxu1 %v1001_v21  ;;  %vm570_vm2 = vcmp.lt.s32.totalorder %v1374_v32, 109  ;;  %vm551_vm3 = vcmp.lt.s32.totalorder %v1374_v32, 110  ;;  %vm532_vm4 = vcmp.lt.s32.totalorder %v1374_v32, 111  ;;  %vm513_vm5 = vcmp.lt.s32.totalorder %v1374_v32, 127 }
  0x17   :  { %304 = vmatpush1.msra.mxu0 %v30_v35  ;;  %949 = vmatmul.mubr.msk.f32.gmra.mxu1 %vm78_vm1, %v59_v31  ;;  %vm494_vm6 = vcmp.lt.s32.totalorder %v1374_v32, 1  ;;  %vm475_vm7 = vcmp.lt.s32.totalorder %v1374_v32, 17  ;;  %vm456_vm8 = vcmp.lt.s32.totalorder %v1374_v32, 18  ;;  %vm437_vm9 = vcmp.lt.s32.totalorder %v1374_v32, 19 }
  0x18   :  { %952 = vmatmul.mubr.msk.f32.vlgmr.msra.gmra.mxu0 %vm78_vm1, %v57_v20  ;;  %672 = vmatprep.mubr.f32.mxu1 %v1001_v21  ;;  %v580_v20 = vld [vmem:[%s1681_s5] sm:$0xff] }
  0x19   :  { %343 = vmatprep.mubr.f32.mxu0 %v1001_v21 }
  0x1c   :  { %953 = vmatmul.mubr.msk.f32.gmra.mxu0 %vm78_vm1, %v58_v26 }
  0x1d   :  { %349 = vmatprep.mubr.f32.mxu0 %v1001_v21 }
  0x20   :  { %954 = vmatmul.mubr.msk.f32.gmra.mxu0 %vm78_vm1, %v59_v31 }
  0x21   :  { %755 = vmatprep.mubr.f32.mxu0 %v1001_v21 }
  0x8a   :  { %v1194_v43 = vpop.permute.xlu0 %65 }
  0xcc   :  { %v173_v44 = vpop.f32.mrf.mxu0  ;;  %v256_v45 = vpop.f32.mrf.mxu1 }
  0xcd   :  { %v174_v46 = vadd.f32 %v173_v44, %v1194_v43  ;;  %v257_v48 = vadd.f32 %v256_v45, %v1194_v43 }
  0xce   :  { %v175_v54 = vpop.f32.mrf.mxu0  ;;  %v258_v60 = vpop.f32.mrf.mxu1 }
  0xcf   :  { %v356_v50 = vmax.f32 %v174_v46, 0.0  ;;  %v358_v51 = vmax.f32 %v257_v48, 0.0  ;;  %v176_v55 = vadd.f32 %v175_v54, %v1194_v43  ;;  %v259_v62 = vadd.f32 %v258_v60, %v1194_v43 }
  0xd0   :  { %v1250_v61 = vpop.f32.mrf.mxu0 }
  0xd1   :  { %v1205_v52 = vmul.f32 %v1198_v47, %v356_v50  ;;  %v1208_v53 = vmul.f32 %v1202_v49, %v358_v51  ;;  %v357_v57 = vmax.f32 %v176_v55, 0.0  ;;  %v359_v1 = vmax.f32 %v259_v62, 0.0 }
  0xd2   :  { %v1258_v0 = vpop.f32.mrf.mxu0 }
  0xd3   :  { %562 = vrot.lane.b32.xlu1 %v1208_v53, %s1003_s1  ;;  %539 = vrot.lane.b32.xlu0 %v1205_v52, %s1004_s23  ;;  %v1240_v59 = vmul.f32 %v1233_v58, %v357_v57  ;;  %v1274_v4 = vmul.f32 %v1265_v2, %v359_v1  ;;  %v262_v32 = vpop.f32.mrf.mxu1 }
  0xd4   :  { %v1267_v3 = vpop.f32.mrf.mxu0 }
  0xd6   :  { %v1276_v5 = vpop.f32.mrf.mxu0 }
  0xd7   :  { %524 = vrot.lane.b32.xlu0 %v1208_v53, %s1005_s24  ;;  %558 = vrot.lane.b32.xlu1 %v1205_v52, %s1003_s1 }
  0xd8   :  { %v339_v6 = vpop.f32.mrf.mxu0 }
  0xd9   :  { %v340_v7 = vadd.f32 %v339_v6, %v1194_v43 }
  0xda   :  { %v341_v11 = vpop.f32.mrf.mxu0 }
  0xdb   :  { %501 = vrot.lane.b32.xlu0 %v1205_v52, %s1006_s25  ;;  %543 = vrot.lane.b32.xlu1 %v1208_v53, %s1004_s23  ;;  %v360_v9 = vmax.f32 %v340_v7, 0.0  ;;  %v342_v13 = vadd.f32 %v341_v11, %v1194_v43 }
  0xdd   :  { %v1300_v12 = vmul.f32 %v1293_v10, %v360_v9  ;;  %v361_v14 = vmax.f32 %v342_v13, 0.0 }
  0xdf   :  { %463 = vrot.lane.b32.xlu0 %v1205_v52, %s1007_s26  ;;  %520 = vrot.lane.b32.xlu1 %v1205_v52, %s1005_s24  ;;  %v1312_v15 = vmul.f32 %v1190_v40, %v361_v14 }
  0xe3   :  { %423 = vrot.lane.b32.xlu0 %v1205_v52, %s1008_s27  ;;  %505 = vrot.lane.b32.xlu1 %v1208_v53, %s1006_s25 }
  0xe7   :  { %486 = vrot.lane.b32.xlu0 %v1208_v53, %s1009_s28  ;;  %482 = vrot.lane.b32.xlu1 %v1205_v52, %s1009_s28 }
  0xeb   :  { %560 = vrot.lane.b32.xlu0 %v1240_v59, %s1003_s1  ;;  %444 = vrot.lane.b32.xlu1 %v1205_v52, %s1010_s29 }
  0xef   :  { %541 = vrot.lane.b32.xlu0 %v1240_v59, %s1004_s23  ;;  %467 = vrot.lane.b32.xlu1 %v1208_v53, %s1007_s26 }
  0xf3   :  { %503 = vrot.lane.b32.xlu0 %v1240_v59, %s1006_s25  ;;  %448 = vrot.lane.b32.xlu1 %v1208_v53, %s1010_s29 }
  0xf7   :  { %484 = vrot.lane.b32.xlu0 %v1240_v59, %s1009_s28  ;;  %522 = vrot.lane.b32.xlu1 %v1240_v59, %s1005_s24 }
  0xfb   :  { %446 = vrot.lane.b32.xlu0 %v1240_v59, %s1010_s29  ;;  %465 = vrot.lane.b32.xlu1 %v1240_v59, %s1007_s26 }
  0xff   :  { %545 = vrot.lane.b32.xlu0 %v1274_v4, %s1004_s23  ;;  %564 = vrot.lane.b32.xlu1 %v1274_v4, %s1003_s1 }
 0x103   :  { %507 = vrot.lane.b32.xlu0 %v1274_v4, %s1006_s25  ;;  %425 = vrot.lane.b32.xlu1 %v1240_v59, %s1008_s27 }
 0x107   :  { %469 = vrot.lane.b32.xlu0 %v1274_v4, %s1007_s26  ;;  %526 = vrot.lane.b32.xlu1 %v1274_v4, %s1005_s24 }
 0x10b   :  { %450 = vrot.lane.b32.xlu0 %v1274_v4, %s1010_s29  ;;  %488 = vrot.lane.b32.xlu1 %v1274_v4, %s1009_s28 }
 0x10f   :  { %566 = vrot.lane.b32.xlu0 %v1300_v12, %s1003_s1  ;;  %547 = vrot.lane.b32.xlu1 %v1300_v12, %s1004_s23 }
 0x113   :  { %528 = vrot.lane.b32.xlu0 %v1300_v12, %s1005_s24  ;;  %509 = vrot.lane.b32.xlu1 %v1300_v12, %s1006_s25 }
 0x117   :  { %473 = vrot.lane.b32.xlu0 %v1312_v15, %s1007_s26  ;;  %492 = vrot.lane.b32.xlu1 %v1312_v15, %s1009_s28 }
 0x11b   :  { %433 = vrot.lane.b32.xlu0 %v1312_v15, %s1008_s27  ;;  %454 = vrot.lane.b32.xlu1 %v1312_v15, %s1010_s29 }
 0x11f   :  { %549 = vrot.lane.b32.xlu0 %v1312_v15, %s1004_s23  ;;  %568 = vrot.lane.b32.xlu1 %v1312_v15, %s1003_s1 }
 0x123   :  { %511 = vrot.lane.b32.xlu0 %v1312_v15, %s1006_s25  ;;  %530 = vrot.lane.b32.xlu1 %v1312_v15, %s1005_s24 }
 0x127   :  { %427 = vrot.lane.b32.xlu0 %v1208_v53, %s1008_s27  ;;  %490 = vrot.lane.b32.xlu1 %v1300_v12, %s1009_s28 }
 0x12b   :  { %471 = vrot.lane.b32.xlu0 %v1300_v12, %s1007_s26  ;;  %429 = vrot.lane.b32.xlu1 %v1274_v4, %s1008_s27 }
 0x12f   :  { %431 = vrot.lane.b32.xlu0 %v1300_v12, %s1008_s27  ;;  %452 = vrot.lane.b32.xlu1 %v1300_v12, %s1010_s29 }
 0x133   :  { %590 = vperm.xlu0 %977, %v581_v16   ;;  %70 = vperm.xlu1 %978, %v61_v17  }
 0x137   :  { %595 = vperm.xlu0 %977, %v582_v18   ;;  %75 = vperm.xlu1 %978, %v62_v19  }
 0x13b   :  { %585 = vperm.xlu0 %977, %v580_v20  }
 0x145   :  { %v563_v22 = vpop.permute.xlu1 %562  ;;  %v1357_v23 = vpop.permute.xlu0 %539 }
 0x149   :  { %v1359_v24 = vpop.permute.xlu0 %524  ;;  %v1361_v25 = vpop.permute.xlu1 %558 }
 0x14d   :  { %v1363_v26 = vpop.permute.xlu0 %501  ;;  %v544_v27 = vpop.permute.xlu1 %543 }
 0x151   :  { %v1365_v28 = vpop.permute.xlu0 %463  ;;  %v1367_v29 = vpop.permute.xlu1 %520 }
 0x155   :  { %v1369_v30 = vpop.permute.xlu0 %423  ;;  %v1371_v31 = vpop.permute.xlu1 %505 }
 0x159   :  { %v1376_v33 = vpop.permute.xlu0 %486  ;;  %v1378_v34 = vpop.permute.xlu1 %482 }
 0x15d   :  { %v561_v35 = vpop.permute.xlu0 %560  ;;  %v1381_v37 = vpop.permute.xlu1 %444 }
 0x15e   :  { %v575_v38 = vsel %vm570_vm2, %v1361_v25, %v561_v35  ;;  %v574_v39 = vsel %vm570_vm2, %v561_v35, %v563_v22 }
 0x15f   :  { %622 = vmatprep.subr.mxu1 %v574_v39 }
 0x160   :  { %623 = vmatpush1.msra.mxu1 %v575_v38 }
 0x161   :  { %v542_v36 = vpop.permute.xlu0 %541  ;;  %v1389_v41 = vpop.permute.xlu1 %467 }
 0x162   :  { %v556_v42 = vsel %vm551_vm3, %v1357_v23, %v542_v36  ;;  %v555_v43 = vsel %vm551_vm3, %v542_v36, %v544_v27 }
 0x163   :  { %624 = vmatprep.subr.mxu1 %v555_v43 }
 0x164   :  { %625 = vmatpush1.msra.mxu1 %v556_v42 }
 0x165   :  { %v504_v44 = vpop.permute.xlu0 %503  ;;  %v1396_v45 = vpop.permute.xlu1 %448 }
 0x166   :  { %v517_v54 = vsel %vm513_vm5, %v504_v44, %v1371_v31  ;;  %v518_v55 = vsel %vm513_vm5, %v1363_v26, %v504_v44 }
 0x169   :  { %v485_v46 = vpop.permute.xlu0 %484  ;;  %v523_v48 = vpop.permute.xlu1 %522 }
 0x16a   :  { %v537_v50 = vsel %vm532_vm4, %v1367_v29, %v523_v48  ;;  %v536_v51 = vsel %vm532_vm4, %v523_v48, %v1359_v24  ;;  %v499_v60 = vsel %vm494_vm6, %v1378_v34, %v485_v46 }
 0x16b   :  { %626 = vmatprep.subr.mxu1 %v536_v51 }
 0x16c   :  { %627 = vmatpush1.msra.mxu1 %v537_v50 }
 0x16d   :  { %v1413_v56 = vpop.permute.xlu0 %446  ;;  %628 = vmatprep.subr.mxu1 %v517_v54  ;;  %v466_v57 = vpop.permute.xlu1 %465 }
 0x16e   :  { %629 = vmatpush1.msra.mxu1 %v518_v55  ;;  %v479_v44 = vsel %vm475_vm7, %v466_v57, %v1389_v41  ;;  %v460_v50 = vsel %vm456_vm8, %v1413_v56, %v1396_v45 }
 0x16f   :  { %630 = vmatprep.subr.mxu1 %v1240_v59 }
 0x170   :  { %631 = vmatpush1.msra.mxu1 %v1205_v52 }
 0x171   :  { %v546_v62 = vpop.permute.xlu0 %545  ;;  %632 = vmatprep.subr.mxu1 %v499_v60  ;;  %v565_v63 = vpop.permute.xlu1 %564 }
 0x172   :  { %v573_v14 = vsel %vm570_vm2, %v563_v22, %v565_v63  ;;  %v554_v17 = vsel %vm551_vm3, %v544_v27, %v546_v62 }
 0x175   :  { %v508_v1 = vpop.permute.xlu0 %507  ;;  %v1420_v6 = vpop.permute.xlu1 %425 }
 0x176   :  { %v516_v35 = vsel %vm513_vm5, %v1371_v31, %v508_v1  ;;  %v480_v31 = vsel %vm475_vm7, %v1365_v28, %v466_v57 }
 0x179   :  { %v1422_v7 = vpop.permute.xlu0 %469  ;;  %v527_v8 = vpop.permute.xlu1 %526 }
 0x17a   :  { %v535_v22 = vsel %vm532_vm4, %v1359_v24, %v527_v8 }
 0x17d   :  { %v1424_v9 = vpop.permute.xlu0 %450  ;;  %v1426_v11 = vpop.permute.xlu1 %488 }
 0x181   :  { %v567_v59 = vpop.permute.xlu0 %566  ;;  %v1428_v13 = vpop.permute.xlu1 %547 }
 0x182   :  { %v572_v52 = vsel %vm570_vm2, %v565_v63, %v567_v59  ;;  %v553_v16 = vsel %vm551_vm3, %v546_v62, %v1428_v13 }
 0x183   :  { %705 = vmatprep.subr.mxu0 %v572_v52 }
 0x184   :  { %706 = vmatpush1.msra.mxu0 %v573_v14 }
 0x185   :  { %v1439_v18 = vpop.permute.xlu0 %528  ;;  %707 = vmatprep.subr.mxu0 %v553_v16  ;;  %v1441_v19 = vpop.permute.xlu1 %509 }
 0x186   :  { %708 = vmatpush1.msra.mxu0 %v554_v17  ;;  %v534_v20 = vsel %vm532_vm4, %v527_v8, %v1439_v18  ;;  %v515_v27 = vsel %vm513_vm5, %v508_v1, %v1441_v19 }
 0x187   :  { %709 = vmatprep.subr.mxu0 %v534_v20 }
 0x188   :  { %710 = vmatpush1.msra.mxu0 %v535_v22  ;;  %v264_v22 = vpop.f32.mrf.mxu1 }
 0x189   :  { %v1456_v38 = vpop.permute.xlu0 %473  ;;  %711 = vmatprep.subr.mxu0 %v515_v27  ;;  %v1458_v39 = vpop.permute.xlu1 %492 }
 0x18a   :  { %v500_v24 = vsel %vm494_vm6, %v1458_v39, %v1378_v34  ;;  %712 = vmatpush1.msra.mxu0 %v516_v35  ;;  %v481_v36 = vsel %vm475_vm7, %v1456_v38, %v1365_v28  ;;  %v497_v34 = vsel %vm494_vm6, %v1376_v33, %v1426_v11  ;;  %v268_v27 = vpop.f32.mrf.mxu1 }
 0x18b   :  { %633 = vmatpush1.msra.mxu1 %v500_v24  ;;  %713 = vmatprep.subr.mxu0 %v1274_v4  ;;  %v498_v4 = vsel %vm494_vm6, %v485_v46, %v1376_v33  ;;  %v478_v33 = vsel %vm475_vm7, %v1389_v41, %v1422_v7  ;;  %v442_v46 = vsel %vm437_vm9, %v1369_v30, %v1420_v6 }
 0x18c   :  { %634 = vmatprep.subr.mxu1 %v480_v31  ;;  %714 = vmatpush1.msra.mxu0 %v1208_v53  ;;  %v461_v53 = vsel %vm456_vm8, %v1381_v37, %v1413_v56  ;;  %v459_v41 = vsel %vm456_vm8, %v1396_v45, %v1424_v9  ;;  %v578_v45 = vld [vmem:[%s1680_s4 + $0x8] sm:$0xff] }
 0x18d   :  { %v1482_v42 = vpop.permute.xlu0 %433  ;;  %635 = vmatpush1.msra.mxu1 %v481_v36  ;;  %715 = vmatprep.subr.mxu0 %v497_v34  ;;  %v1484_v43 = vpop.permute.xlu1 %454 }
 0x18e   :  { %v462_v28 = vsel %vm456_vm8, %v1484_v43, %v1381_v37  ;;  %636 = vmatprep.subr.mxu1 %v461_v53  ;;  %716 = vmatpush1.msra.mxu0 %v498_v4  ;;  %v1508_v37 = vld [vmem:[%s1680_s4] sm:$0xff]  ;;  %v443_v48 = vsel %vm437_vm9, %v1482_v42, %v1369_v30 }
 0x18f   :  { %637 = vmatpush1.msra.mxu1 %v462_v28  ;;  %717 = vmatprep.subr.mxu0 %v478_v33 }
 0x190   :  { %638 = vmatprep.subr.mxu1 %v442_v46  ;;  %718 = vmatpush1.msra.mxu0 %v479_v44 }
 0x191   :  { %v550_v51 = vpop.permute.xlu0 %549  ;;  %639 = vmatpush1.msra.mxu1 %v443_v48  ;;  %719 = vmatprep.subr.mxu0 %v459_v41  ;;  %v569_v54 = vpop.permute.xlu1 %568 }
 0x192   :  { %v571_v55 = vsel %vm570_vm2, %v567_v59, %v569_v54  ;;  %955 = vmatmul.mubr.msk.f32.vlgmr.msra.gmra.mxu1 %vm598_vm10, %v1508_v37  ;;  %720 = vmatpush1.msra.mxu0 %v460_v50  ;;  %v576_v30 = vsel %vm570_vm2, %v569_v54, %v1361_v25  ;;  %v557_v56 = vsel %vm551_vm3, %v550_v51, %v1357_v23  ;;  %v579_v23 = vld [vmem:[%s1680_s4 + $0x10] sm:$0xff] }
 0x193   :  { %788 = vmatprep.subr.mxu1 %v576_v30  ;;  %678 = vmatprep.mubr.f32.mxu1 %v1001_v21  ;;  %v552_v62 = vsel %vm551_vm3, %v1428_v13, %v550_v51 }
 0x194   :  { %789 = vmatpush1.msra.mxu1 %v571_v55 }
 0x195   :  { %v512_v57 = vpop.permute.xlu0 %511  ;;  %790 = vmatprep.subr.mxu1 %v557_v56  ;;  %v531_v60 = vpop.permute.xlu1 %530 }
 0x196   :  { %v533_v25 = vsel %vm532_vm4, %v1439_v18, %v531_v60  ;;  %956 = vmatmul.mubr.msk.f32.gmra.mxu1 %vm598_vm10, %v578_v45  ;;  %v538_v63 = vsel %vm532_vm4, %v531_v60, %v1367_v29  ;;  %v519_v8 = vsel %vm513_vm5, %v512_v57, %v1363_v26  ;;  %v514_v13 = vsel %vm513_vm5, %v1441_v19, %v512_v57 }
 0x197   :  { %791 = vmatpush1.msra.mxu1 %v552_v62  ;;  %684 = vmatprep.mubr.f32.mxu1 %v1001_v21 }
 0x198   :  { %792 = vmatprep.subr.mxu1 %v538_v63 }
 0x199   :  { %793 = vmatpush1.msra.mxu1 %v533_v25  ;;  %v428_v1 = vpop.permute.xlu0 %427  ;;  %v491_v59 = vpop.permute.xlu1 %490 }
 0x19a   :  { %794 = vmatprep.subr.mxu1 %v519_v8  ;;  %957 = vmatmul.mubr.msk.f32.gmra.mxu1 %vm598_vm10, %v579_v23  ;;  %v495_v26 = vsel %vm494_vm6, %v491_v59, %v1458_v39  ;;  %v496_v14 = vsel %vm494_vm6, %v1426_v11, %v491_v59  ;;  %v441_v17 = vsel %vm437_vm9, %v1420_v6, %v428_v1  ;;  %v345_v39 = vpop.f32.mrf.mxu0 }
 0x19b   :  { %795 = vmatpush1.msra.mxu1 %v514_v13  ;;  %838 = vmatprep.mubr.f32.mxu1 %v1001_v21 }
 0x19c   :  { %796 = vmatprep.subr.mxu1 %v1312_v15 }
 0x19d   :  { %797 = vmatpush1.msra.mxu1 %v1300_v12  ;;  %v472_v29 = vpop.permute.xlu0 %471  ;;  %v430_v52 = vpop.permute.xlu1 %429 }
 0x19e   :  { %v477_v16 = vsel %vm475_vm7, %v1422_v7, %v472_v29  ;;  %798 = vmatprep.subr.mxu1 %v495_v26  ;;  %v440_v15 = vsel %vm437_vm9, %v428_v1, %v430_v52  ;;  %v476_v12 = vsel %vm475_vm7, %v472_v29, %v1456_v38  ;;  %v270_v38 = vpop.f32.mrf.mxu1 }
 0x19f   :  { %799 = vmatpush1.msra.mxu1 %v496_v14  ;;  %721 = vmatprep.subr.mxu0 %v440_v15 }
 0x1a0   :  { %800 = vmatprep.subr.mxu1 %v476_v12  ;;  %722 = vmatpush1.msra.mxu0 %v441_v17 }
 0x1a1   :  { %801 = vmatpush1.msra.mxu1 %v477_v16  ;;  %v432_v11 = vpop.permute.xlu0 %431  ;;  %958 = vmatmul.mubr.msk.f32.vlgmr.msra.gmra.mxu0 %vm598_vm10, %v1508_v37  ;;  %v453_v7 = vpop.permute.xlu1 %452 }
 0x1a2   :  { %v458_v18 = vsel %vm456_vm8, %v1424_v9, %v453_v7  ;;  %v457_v19 = vsel %vm456_vm8, %v453_v7, %v1484_v43  ;;  %761 = vmatprep.mubr.f32.mxu0 %v1001_v21  ;;  %v438_v6 = vsel %vm437_vm9, %v432_v11, %v1482_v42  ;;  %v439_v20 = vsel %vm437_vm9, %v430_v52, %v432_v11  ;;  %v347_v42 = vpop.f32.mrf.mxu0 }
 0x1a3   :  { %802 = vmatprep.subr.mxu1 %v457_v19 }
 0x1a4   :  { %803 = vmatpush1.msra.mxu1 %v458_v18  ;;  %v351_v33 = vpop.f32.mrf.mxu0 }
 0x1a5   :  { %959 = vmatmul.mubr.msk.f32.gmra.mxu0 %vm598_vm10, %v578_v45  ;;  %804 = vmatprep.subr.mxu1 %v438_v6 }
 0x1a6   :  { %805 = vmatpush1.msra.mxu1 %v439_v20  ;;  %767 = vmatprep.mubr.f32.mxu0 %v1001_v21  ;;  %v1617_v41 = vpop.f32.mrf.mxu0 }
 0x1a7   :  { %961 = vmatmul.mubr.msk.f32.vlgmr.msra.gmra.mxu1 %vm598_vm10, %v1508_v37 }
 0x1a8   :  { %844 = vmatprep.mubr.f32.mxu1 %v1001_v21 }
 0x1a9   :  { %960 = vmatmul.mubr.msk.f32.gmra.mxu0 %vm598_vm10, %v579_v23 }
 0x1ab   :  { %962 = vmatmul.mubr.msk.f32.gmra.mxu1 %vm598_vm10, %v578_v45 }
 0x1ac   :  { %850 = vmatprep.mubr.f32.mxu1 %v1001_v21 }
 0x1ae   :  { %v1600_v9 = vpop.permute.xlu0 %590  ;;  %v71_v34 = vpop.permute.xlu1 %70 }
 0x1af   :  { %963 = vmatmul.mubr.msk.f32.gmra.mxu1 %vm598_vm10, %v579_v23  ;;  %v182_v53 = vadd.f32 %v1258_v0, %v71_v34  ;;  %v180_v28 = vadd.f32 %v1250_v61, %v71_v34  ;;  %v263_v50 = vadd.f32 %v262_v32, %v71_v34  ;;  %v265_v30 = vadd.f32 %v264_v22, %v71_v34 }
 0x1b0   :  { %v346_v59 = vadd.f32 %v345_v39, %v71_v34  ;;  %v348_v13 = vadd.f32 %v347_v42, %v71_v34 }
 0x1b1   :  { %v363_v46 = vmax.f32 %v182_v53, 0.0  ;;  %v362_v37 = vmax.f32 %v180_v28, 0.0  ;;  %v364_v57 = vmax.f32 %v263_v50, 0.0  ;;  %v365_v23 = vmax.f32 %v265_v30, 0.0 }
 0x1b2   :  { %v1602_v35 = vpop.permute.xlu0 %595  ;;  %v76_v55 = vpop.permute.xlu1 %75  ;;  %v366_v32 = vmax.f32 %v346_v59, 0.0  ;;  %v367_v22 = vmax.f32 %v348_v13, 0.0 }
 0x1b3   :  { %v412_v54 = vmul.f32 %v1233_v58, %v363_v46  ;;  %v411_v45 = vmul.f32 %v1198_v47, %v362_v37  ;;  %v186_v25 = vadd.f32 %v1267_v3, %v76_v55  ;;  %v188_v29 = vadd.f32 %v1276_v5, %v76_v55 }
 0x1b4   :  { %v413_v14 = vmul.f32 %v1202_v49, %v364_v57  ;;  %v269_v16 = vadd.f32 %v268_v27, %v76_v55  ;;  %v271_v15 = vadd.f32 %v270_v38, %v76_v55  ;;  %v414_v18 = vmul.f32 %v1265_v2, %v365_v23 }
 0x1b5   :  { %v368_v17 = vmax.f32 %v186_v25, 0.0  ;;  %v369_v39 = vmax.f32 %v188_v29, 0.0  ;;  %v352_v46 = vadd.f32 %v351_v33, %v76_v55  ;;  %v354_v33 = vadd.f32 %v1617_v41, %v76_v55 }
 0x1b6   :  { %v1604_v24 = vpop.permute.xlu0 %585  ;;  %v371_v42 = vmax.f32 %v271_v15, 0.0 }
 0x1b7   :  { %v417_v53 = vmul.f32 %v1198_v47, %v368_v17 }
 0x1b8   :  { %v420_v41 = vmul.f32 %v1265_v2, %v371_v42 }
 0x252   :  { %v674_v31 = vpop.f32.mrf.mxu1 }
 0x253   :  { %v675_v36 = vadd.f32 %v674_v31, %v1604_v24 }
 0x254   :  { %v676_v4 = vpop.f32.mrf.mxu1 }
 0x255   :  { %857 = vst [vmem:[%s1682_s6] sm:$0xff] %v675_v36  ;;  %v677_v21 = vadd.f32 %v676_v4, %v1604_v24 }
 0x256   :  { %v680_v43 = vpop.f32.mrf.mxu1 }
 0x257   :  { %858 = vst [vmem:[%s1682_s6 + $0x8] sm:$0xff] %v677_v21  ;;  %v681_v51 = vadd.f32 %v680_v43, %v1600_v9  ;;  %v370_v21 = vmax.f32 %v269_v16, 0.0 }
 0x258   :  { %v682_v44 = vpop.f32.mrf.mxu1 }
 0x259   :  { %v683_v48 = vadd.f32 %v682_v44, %v1600_v9  ;;  %v863_v62 = vsub.f32 %v681_v51, %v411_v45  ;;  %v415_v51 = vmul.f32 %v1293_v10, %v366_v32  ;;  %v419_v23 = vmul.f32 %v1202_v49, %v370_v21 }
 0x25a   :  { %v686_v56 = vpop.f32.mrf.mxu1 }
 0x25b   :  { %v864_v0 = vsub.f32 %v683_v48, %v412_v54  ;;  %v875_v12 = vmul.f32 %v863_v62, %v1198_v47  ;;  %v687_v27 = vadd.f32 %v686_v56, %v1602_v35 }
 0x25c   :  { %v688_v26 = vpop.f32.mrf.mxu1 }
 0x25d   :  { %v876_v8 = vmul.f32 %v864_v0, %v1233_v58  ;;  %v887_v43 = vmul.f32 %v875_v12, %v875_v12  ;;  %v689_v44 = vadd.f32 %v688_v26, %v1602_v35  ;;  %v869_v45 = vsub.f32 %v687_v27, %v417_v53 }
 0x25e   :  { %v416_v0 = vmul.f32 %v1190_v40, %v367_v22  ;;  %v373_v26 = vmax.f32 %v354_v33, 0.0 }
 0x25f   :  { %v888_v20 = vmul.f32 %v876_v8, %v876_v8  ;;  %v372_v8 = vmax.f32 %v352_v46, 0.0  ;;  %v881_v55 = vmul.f32 %v869_v45, %v1198_v47 }
 0x260   :  { %v422_v47 = vmul.f32 %v1190_v40, %v373_v26 }
 0x261   :  { %v757_v61 = vpop.f32.mrf.mxu0  ;;  %v899_v50 = vadd.f32 %v888_v20, %v887_v43  ;;  %v421_v17 = vmul.f32 %v1293_v10, %v372_v8 }
 0x262   :  { %v758_v60 = vadd.f32 %v757_v61, %v1604_v24 }
 0x263   :  { %v759_v63 = vpop.f32.mrf.mxu0 }
 0x264   :  { %859 = vst [vmem:[%s1682_s6 + $0x10] sm:$0xff] %v758_v60  ;;  %v760_v1 = vadd.f32 %v759_v63, %v1604_v24 }
 0x265   :  { %v763_v52 = vpop.f32.mrf.mxu0 }
 0x266   :  { %860 = vst [vmem:[%s1682_s6 + $0x18] sm:$0xff] %v760_v1  ;;  %v764_v3 = vadd.f32 %v763_v52, %v1600_v9 }
 0x267   :  { %v765_v11 = vpop.f32.mrf.mxu0  ;;  %v840_v7 = vpop.f32.mrf.mxu1 }
 0x268   :  { %v865_v5 = vsub.f32 %v764_v3, %v413_v14  ;;  %v766_v19 = vadd.f32 %v765_v11, %v1600_v9  ;;  %v841_v6 = vadd.f32 %v840_v7, %v1604_v24 }
 0x269   :  { %v842_v31 = vpop.f32.mrf.mxu1  ;;  %v769_v34 = vpop.f32.mrf.mxu0 }
 0x26a   :  { %v877_v38 = vmul.f32 %v865_v5, %v1202_v49  ;;  %v866_v36 = vsub.f32 %v766_v19, %v414_v18  ;;  %861 = vst [vmem:[%s1682_s6 + $0x20] sm:$0xff] %v841_v6  ;;  %v843_v4 = vadd.f32 %v842_v31, %v1604_v24  ;;  %v418_v24 = vmul.f32 %v1233_v58, %v369_v39 }
 0x26b   :  { %v846_v28 = vpop.f32.mrf.mxu1  ;;  %v770_v56 = vadd.f32 %v769_v34, %v1602_v35  ;;  %v771_v61 = vpop.f32.mrf.mxu0  ;;  %v893_v19 = vmul.f32 %v881_v55, %v881_v55 }
 0x26c   :  { %v889_v37 = vmul.f32 %v877_v38, %v877_v38  ;;  %v878_v48 = vmul.f32 %v866_v36, %v1265_v2  ;;  %862 = vst [vmem:[%s1682_s6 + $0x28] sm:$0xff] %v843_v4  ;;  %v847_v54 = vadd.f32 %v846_v28, %v1600_v9  ;;  %v870_v1 = vsub.f32 %v689_v44, %v418_v24  ;;  %s1011_s6 = smov [#allocation2]  }
 0x26d   :  { %v848_v30 = vpop.f32.mrf.mxu1  ;;  %v772_v59 = vadd.f32 %v771_v61, %v1602_v35  ;;  %v871_v52 = vsub.f32 %v770_v56, %v419_v23  ;;  %s930_s29 = sshll.u32 %s1011_s6, 4  ;;  %s931_s29 = int_to_ptr.vmem [resolvable:$true] %s930_s29 }
 0x26e   :  { %v900_v57 = vadd.f32 %v899_v50, %v889_v37  ;;  %v890_v60 = vmul.f32 %v878_v48, %v878_v48  ;;  %v867_v62 = vsub.f32 %v847_v54, %v415_v51  ;;  %v849_v25 = vadd.f32 %v848_v30, %v1600_v9  ;;  %s979_s8 = scalar_lea.vmem %s931_s29, 16  ;;  %s983_s9 = scalar_lea.vmem %s931_s29, 32 }
 0x26f   :  { %v852_v63 = vpop.f32.mrf.mxu1  ;;  %v882_v12 = vmul.f32 %v870_v1, %v1233_v58  ;;  %v872_v11 = vsub.f32 %v772_v59, %v420_v41  ;;  %v883_v6 = vmul.f32 %v871_v52, %v1202_v49  ;;  %p980_p0 = scmp.ne.s32.totalorder %s931_s29, %s979_s8  ;;  %p984_p1 = scmp.lt.s32.totalorder %s931_s29, %s931_s29 }
 0x270   :  { %v879_v13 = vmul.f32 %v867_v62, %v1293_v10  ;;  %v868_v29 = vsub.f32 %v849_v25, %v416_v0  ;;  %v901_v3 = vadd.f32 %v900_v57, %v890_v60  ;;  %v853_v15 = vadd.f32 %v852_v63, %v1602_v35  ;;  %p985_p2 = scmp.lt.s32.totalorder %s983_s9, %s979_s8 }
 0x271   :  { %v854_v14 = vpop.f32.mrf.mxu1  ;;  %v894_v22 = vmul.f32 %v882_v12, %v882_v12  ;;  %v884_v39 = vmul.f32 %v872_v11, %v1265_v2  ;;  %v895_v58 = vmul.f32 %v883_v6, %v883_v6 }
 0x272   :  { %v891_v16 = vmul.f32 %v879_v13, %v879_v13  ;;  %v880_v9 = vmul.f32 %v868_v29, %v1190_v40  ;;  %v855_v5 = vadd.f32 %v854_v14, %v1602_v35  ;;  %v873_v32 = vsub.f32 %v853_v15, %v421_v17  ;;  %p986_p3 = por %p985_p2, %p984_p1 }
 0x273   :  { %v896_v34 = vmul.f32 %v884_v39, %v884_v39 }
 0x274   :  { %v902_v7 = vadd.f32 %v901_v3, %v891_v16  ;;  %v892_v18 = vmul.f32 %v880_v9, %v880_v9  ;;  %v874_v27 = vsub.f32 %v855_v5, %v422_v47  ;;  %v885_v38 = vmul.f32 %v873_v32, %v1293_v10  ;;  %p987_p4 = pnand %p986_p3, %p980_p0 }
 0x276   :  { %v903_v20 = vadd.f32 %v902_v7, %v892_v18  ;;  %v886_v4 = vmul.f32 %v874_v27, %v1190_v40  ;;  %v897_v21 = vmul.f32 %v885_v38, %v885_v38 }
 0x278   :  { %v904_v31 = vadd.f32 %v903_v20, %v893_v19  ;;  %v898_v43 = vmul.f32 %v886_v4, %v886_v4 }
 0x27a   :  { %v905_v36 = vadd.f32 %v904_v31, %v894_v22 }
 0x27c   :  { %v906_v35 = vadd.f32 %v905_v36, %v895_v58 }
 0x27e   :  { %v907_v42 = vadd.f32 %v906_v35, %v896_v34 }
 0x280   :  { %v908_v53 = vadd.f32 %v907_v42, %v897_v21 }
 0x282   :  { %v909_v49 = vadd.f32 %v908_v53, %v898_v43 }
 0x284   :  { %910 = vadd.xlane.f32.xlu1 %v909_v49 }
 0x30d   :  { %v911_v28 = vpop.xlane.xlu1 %910 }
 0x30e   :  { %v912_v44 = vrot.slane %v911_v28, 4 }
 0x310   :  { %v913_v46 = vadd.f32 %v912_v44, %v911_v28 }
 0x312   :  { %v914_v2 = vrot.slane %v913_v46, 2 }
 0x314   :  { %v915_v37 = vadd.f32 %v914_v2, %v913_v46 }
 0x316   :  { %v916_v48 = vrot.slane %v915_v37, 1 }
 0x318   :  { %v917_v50 = vadd.f32 %v916_v48, %v915_v37 }
 0x31a   :  { %964 = vpush %v917_v50 }
 0x34b   :  { %s965_s30 = spop %964 }
 0x34c   :  { %v919_v40 = vstv %s965_s30 }
 0x34d   :  { %921 = vst.msk [vmem:[#allocation2] sm:$0x1] %vm920_vm11, %v919_v40 }
 0x34e   :  { %990 = shalt.err (!%p987_p4)
}
 0x34f   :  { %933 = dma.vmem_to_hbm [thread:$0]  %s931_s29, 16, %s1683_s7, [#allocation3]  }
 0x350   :  { %999 = dma.done.wait [#allocation3], 16  }
 0x351   :  { %1000 = vsyncadd [#allocation3], 4294967280 }
 0x352   :  { %939 = vsyncpa [#allocation3], 1 }

</bundles_post_ra>
